<compile_context>
chip_gen: v7x
topology: tpu7x:2x2x1
jax: 0.10.0
libtpu: 0.0.40
codegen_flags: <defaults>
</compile_context>

<pallas_src>
import numpy as np
import jax
import jax.numpy as jnp
from jax.experimental import pallas as pl
from jax.experimental.pallas import tpu as pltpu


_LANE = 128
_SUBLANE = 8


def _add_pe_kernel(x_ref, pe_ref, o_ref):
    # x_ref / o_ref: (TS, B, TD) tile;  pe_ref: (TS, 1, TD) tile.
    # The size-1 batch (sublane) axis broadcasts for free on the VPU.
    o_ref[...] = x_ref[...] + pe_ref[...]


def _round_up(x, m):
    return ((x + m - 1) // m) * m


def _choose_tiles(S, B, D, itemsize, *, target_tile_bytes=6 << 20):
    """Pick (ts, td): sequence rows and lane-chunk per grid step.

    ~6 MiB x-tiles keep per-step overhead <8% on v7x while double-buffered
    in+out+pe stays well under the 48 MiB scoped-VMEM limit on all chips.
    """
    # Lane split only if a single (B, D) row is already wider than the budget.
    td = D
    if B * D * itemsize > target_tile_bytes and D % _LANE == 0 and D > _LANE:
        td = max(_LANE, (target_tile_bytes // (B * _LANE * itemsize)) * _LANE)
        td = min(td, D)
    # TODO(synk): if D % 128 != 0 and a single row still exceeds the budget,
    # a padded lane-split would be needed; fall through with td = D.

    row_bytes = B * td * itemsize
    ts = max(1, target_tile_bytes // row_bytes)
    if ts >= S:
        ts = S
    elif ts >= _SUBLANE:
        ts = (ts // _SUBLANE) * _SUBLANE

    # Megacore (v7x has 2 TCs): make sure non-trivial inputs get >= 2 grid
    # steps along the parallel axes so both cores are used.
    num_d = pl.cdiv(D, td)
    total_bytes = S * B * D * itemsize
    if num_d == 1 and ts >= S and S > _SUBLANE and total_bytes >= (2 << 20):
        ts = min(S, _round_up(-(-S // 2), _SUBLANE))

    return ts, td


def transformer_ae_forward(x, pe, *, dropout_p=0.1, training=False):
    """x: (S, B, D);  pe: (max_len, 1, D).  Eval-mode dropout == identity."""
    if training and dropout_p > 0.0:
        # TODO(synk): training-mode dropout (pltpu.prng_seed + prng_random_bits
        # Bernoulli mask scaled by 1/(1-p)) is not implemented; eval-mode only.
        raise NotImplementedError("training-mode dropout not implemented")

    S, B, D = x.shape
    pe_s = pe[:S].astype(x.dtype)          # (S, 1, D) -- glue slice/cast in JAX

    ts, td = _choose_tiles(S, B, D, x.dtype.itemsize)
    grid = (pl.cdiv(S, ts), pl.cdiv(D, td))

    out = pl.pallas_call(
        _add_pe_kernel,
        out_shape=jax.ShapeDtypeStruct((S, B, D), x.dtype),
        grid_spec=pltpu.PrefetchScalarGridSpec(
            num_scalar_prefetch=0,
            grid=grid,
            in_specs=[
                pl.BlockSpec((ts, B, td), lambda s, d: (s, 0, d)),   # x tile
                pl.BlockSpec((ts, 1, td), lambda s, d: (s, 0, d)),   # pe tile
            ],
            out_specs=pl.BlockSpec((ts, B, td), lambda s, d: (s, 0, d)),
        ),
        # x += pe: reuse x's HBM buffer when the caller donates x.
        input_output_aliases={0: 0},
        compiler_params=pltpu.CompilerParams(
            # Independent tiles along both axes -> shard across TensorCores.
            dimension_semantics=("parallel", "parallel"),
            # Double-buffered in+out+pe at ~6 MiB tiles is ~25 MiB; 48 MiB is
            # safe on every generation (v7x physical VMEM is 64 MiB).
            vmem_limit_bytes=48 * 1024 * 1024,
        ),
    )(x, pe_s)

    return out


def make_positional_encoding(max_len, d_model, dtype=jnp.float32):
    """Deterministic sinusoidal PE, identical to the PyTorch __init__."""
    pe = np.zeros((max_len, d_model), dtype=np.float32)
    position = np.arange(0, max_len, dtype=np.float32)[:, None]
    div_term = np.exp(
        np.arange(0, d_model, 2, dtype=np.float32) * (-np.log(10000.0) / d_model)
    )
    pe[:, 0::2] = np.sin(position * div_term)
    pe[:, 1::2] = np.cos(position * div_term)
    pe = pe[:, None, :]  # unsqueeze(0).transpose(0,1) -> (max_len, 1, d_model)
    return jnp.asarray(pe, dtype=dtype)


if __name__ == "__main__":
    # Small shapes consistent with the module's forward: (seq=8, batch=2, d_model=32)
    S, B, D = 8, 2, 32
    MAX_LEN = 64

    key = jax.random.PRNGKey(0)
    x = jax.random.normal(key, (S, B, D), dtype=jnp.float32)
    pe = make_positional_encoding(MAX_LEN, D)

    # Reference (eval-mode dropout == identity), computed before the kernel
    # since the kernel may alias/donate its input buffer under jit.
    ref = x + pe[:S]

    out = transformer_ae_forward(x, pe)
    out = jax.block_until_ready(out)

    np.testing.assert_allclose(np.asarray(out), np.asarray(ref), rtol=1e-6, atol=1e-6)

    print("KERNEL_OK")
</pallas_src>

<mosaic_0001>
module attributes {stable_mosaic.version = 11 : i64} {
  func.func @_add_pe_kernel(%arg0: i32, %arg1: i32, %arg2: memref<8x2x32xf32, #tpu.memory_space<vmem>>, %arg3: memref<8x1x32xf32, #tpu.memory_space<vmem>>, %arg4: memref<8x2x32xf32, #tpu.memory_space<vmem>>) attributes {dimension_semantics = [#tpu.dimension_semantics<parallel>, #tpu.dimension_semantics<parallel>], iteration_bounds = array<i64: 1, 1>, scalar_prefetch = 0 : i64, scratch_operands = 0 : i64, tpu.core_type = #tpu.core_type<tc>, window_params = [{transform_indices = @transform_0, window_bounds = array<i64: 8, 2, 32>}, {transform_indices = @transform_1, window_bounds = array<i64: 8, 1, 32>}, {transform_indices = @transform_2, window_bounds = array<i64: 8, 2, 32>}]} {
    %c0 = arith.constant 0 : index
    %c0_0 = arith.constant 0 : index
    %c0_1 = arith.constant 0 : index
    %0 = vector.load %arg2[%c0, %c0_0, %c0_1] : memref<8x2x32xf32, #tpu.memory_space<vmem>>, vector<8x2x32xf32>
    %c0_2 = arith.constant 0 : index
    %c0_3 = arith.constant 0 : index
    %c0_4 = arith.constant 0 : index
    %1 = vector.load %arg3[%c0_2, %c0_3, %c0_4] : memref<8x1x32xf32, #tpu.memory_space<vmem>>, vector<8x1x32xf32>
    %2 = vector.broadcast %1 : vector<8x1x32xf32> to vector<8x2x32xf32>
    %3 = arith.addf %0, %2 : vector<8x2x32xf32>
    %c0_5 = arith.constant 0 : index
    %c0_6 = arith.constant 0 : index
    %c0_7 = arith.constant 0 : index
    %4 = vector.load %arg4[%c0_5, %c0_6, %c0_7] : memref<8x2x32xf32, #tpu.memory_space<vmem>>, vector<8x2x32xf32>
    tpu.vector_store %arg4[%c0_5, %c0_6, %c0_7], %3 {strides = array<i32>} : memref<8x2x32xf32, #tpu.memory_space<vmem>>, vector<8x2x32xf32>,
    return
  }
  func.func @transform_0(%arg0: i32, %arg1: i32) -> (i32, i32, i32) {
    %c0_i32 = arith.constant 0 : i32
    %c0_i32_0 = arith.constant 0 : i32
    return %arg0, %c0_i32, %arg1 : i32, i32, i32
  }
  func.func @transform_1(%arg0: i32, %arg1: i32) -> (i32, i32, i32) {
    %c0_i32 = arith.constant 0 : i32
    %c0_i32_0 = arith.constant 0 : i32
    return %arg0, %c0_i32, %arg1 : i32, i32, i32
  }
  func.func @transform_2(%arg0: i32, %arg1: i32) -> (i32, i32, i32) {
    %c0_i32 = arith.constant 0 : i32
    %c0_i32_0 = arith.constant 0 : i32
    return %arg0, %c0_i32, %arg1 : i32, i32, i32
  }
}

</mosaic_0001>

<bundles_post_ra>
// kernel: tpu_custom_call.1
= control target key start
LH: loop header
LB: loop body
LE: loop exit
PB: predicated region body
PF: predicated region fallthrough
CT: control target
= control target key end

     0   :  { %7 = vsyncpa [#allocation3], 0  ;;  %s268_s0 = inlined_call_operand.hbm [shape: f32[8,2,32], index: 0, kind: input, shape index: {}, may-alias: {0,2}]   ;;  %s269_s1 = inlined_call_operand.vmem [shape: f32[8,1,32], index: 1, kind: input, shape index: {}]   ;;  %s270_s2 = inlined_call_operand.hbm [shape: f32[8,2,32], index: 2, kind: output, shape index: {}, may-alias: {0,2}]  }
   0x1   :  { %8 = vsyncpa [#allocation4], 0  ;;  %s184_s9 = smov [#allocation2]   ;;  %s136_s13 = scalar_lea.hbm %s268_s0, 256 }
   0x2   :  { %s14_s10 = sshll.u32 %s184_s9, 4  ;;  %p137_p0 = scmp.ne.s32.totalorder %s268_s0, %s136_s13  ;;  %s15_s10 = int_to_ptr.vmem [resolvable:$true] %s14_s10 }
   0x3   :  { %p140_p1 = scmp.lt.u32.totalorder %s136_s13, %s268_s0 }
   0x5   :  { %p142_p2 = pnand %p140_p1, %p137_p0 }
   0x7   :  { %145 = shalt.err (!%p142_p2)
}
   0x8   :  { %s146_s18 = scalar_lea.vmem %s15_s10, 256  ;;  %p151_p4 = scmp.lt.s32.totalorder %s15_s10, %s15_s10 }
   0x9   :  { %p147_p3 = scmp.ne.s32.totalorder %s15_s10, %s146_s18  ;;  %p152_p5 = scmp.lt.s32.totalorder %s146_s18, %s146_s18 }
   0xb   :  { %p153_p6 = por %p152_p5, %p151_p4 }
   0xd   :  { %p154_p7 = pnand %p153_p6, %p147_p3 }
   0xf   :  { %157 = shalt.err (!%p154_p7)
}
  0x10   :  { %s185_s19 = smov 32   ;;  %s186_s20 = smov 2  }
  0x11   :  { %20 = dma.hbm_to_vmem [thread:$0]  %s268_s0, 256, %s15_s10, [#allocation3], %s185_s19, %s185_s19, %s186_s20  }
  0x12   :  { %180 = dma.done.wait [#allocation3], 256  }
  0x13   :  { %181 = vsyncadd [#allocation3], 4294967040  ;;  %vm98_vm0 = vcmask 254976   ;;  %s187_s23 = smov [#allocation5]   ;;  %v26_v0 = vld [vmem:[#allocation2] sm:$0x3] }
  0x14   :  { %s218_s24 = sshll.u32 %s187_s23, 4  ;;  %v124_v1 = vld [vmem:[%s269_s1] ss:$0 sm:$0xff]  ;;  %v27_v2 = vld [vmem:[#allocation2 + $0x2] sm:$0x3]  ;;  %s113_s24 = int_to_ptr.vmem [resolvable:$true] %s218_s24 }
  0x15   :  { %v90_v3 = vadd.f32 %v124_v1, %v26_v0  ;;  %v125_v4 = vld [vmem:[%s269_s1 + $0x1] ss:$0 sm:$0xff]  ;;  %v28_v5 = vld [vmem:[#allocation2 + $0x4] sm:$0x3]  ;;  %v126_v6 = vld [vmem:[%s269_s1 + $0x2] ss:$0 sm:$0xff]  ;;  %p163_p9 = scmp.lt.s32.totalorder %s113_s24, %s113_s24 }
  0x16   :  { %v91_v7 = vadd.f32 %v125_v4, %v27_v2  ;;  %v92_v8 = vadd.f32 %v126_v6, %v28_v5  ;;  %v29_v9 = vld [vmem:[#allocation2 + $0x6] sm:$0x3]  ;;  %v127_v10 = vld [vmem:[%s269_s1 + $0x3] ss:$0 sm:$0xff]  ;;  %v30_v11 = vld [vmem:[#allocation2 + $0x8] sm:$0x3] }
  0x17   :  { %99 = vst.msk [vmem:[#allocation5] sm:$0x3] %vm98_vm0, %v90_v3  ;;  %v93_v12 = vadd.f32 %v127_v10, %v29_v9  ;;  %v128_v13 = vld [vmem:[%s269_s1 + $0x4] ss:$0 sm:$0xff]  ;;  %v31_v14 = vld [vmem:[#allocation2 + $0xa] sm:$0x3] }
  0x18   :  { %v129_v15 = vld [vmem:[%s269_s1 + $0x5] ss:$0 sm:$0xff]  ;;  %100 = vst.msk [vmem:[#allocation5 + $0x2] sm:$0x3] %vm98_vm0, %v91_v7  ;;  %101 = vst.msk [vmem:[#allocation5 + $0x4] sm:$0x3] %vm98_vm0, %v92_v8  ;;  %v94_v16 = vadd.f32 %v128_v13, %v30_v11 }
  0x19   :  { %v95_v17 = vadd.f32 %v129_v15, %v31_v14  ;;  %v32_v18 = vld [vmem:[#allocation2 + $0xc] sm:$0x3]  ;;  %v130_v19 = vld [vmem:[%s269_s1 + $0x6] ss:$0 sm:$0xff]  ;;  %v33_v20 = vld [vmem:[#allocation2 + $0xe] sm:$0x3] }
  0x1a   :  { %102 = vst.msk [vmem:[#allocation5 + $0x6] sm:$0x3] %vm98_vm0, %v93_v12  ;;  %v96_v21 = vadd.f32 %v130_v19, %v32_v18  ;;  %v131_v22 = vld [vmem:[%s269_s1 + $0x7] ss:$0 sm:$0xff]  ;;  %103 = vst.msk [vmem:[#allocation5 + $0x8] sm:$0x3] %vm98_vm0, %v94_v16 }
  0x1b   :  { %104 = vst.msk [vmem:[#allocation5 + $0xa] sm:$0x3] %vm98_vm0, %v95_v17  ;;  %v97_v23 = vadd.f32 %v131_v22, %v33_v20  ;;  %s158_s12 = scalar_lea.vmem %s113_s24, 256 }
  0x1c   :  { %105 = vst.msk [vmem:[#allocation5 + $0xc] sm:$0x3] %vm98_vm0, %v96_v21  ;;  %p159_p8 = scmp.ne.s32.totalorder %s113_s24, %s158_s12  ;;  %p164_p10 = scmp.lt.s32.totalorder %s158_s12, %s158_s12 }
  0x1d   :  { %106 = vst.msk [vmem:[#allocation5 + $0xe] sm:$0x3] %vm98_vm0, %v97_v23 }
  0x1e   :  { %p165_p11 = por %p164_p10, %p163_p9 }
  0x20   :  { %p166_p12 = pnand %p165_p11, %p159_p8 }
  0x22   :  { %169 = shalt.err (!%p166_p12)
}
  0x23   :  { %s170_s1 = scalar_lea.hbm %s270_s2, 256 }
  0x24   :  { %p171_p13 = scmp.ne.s32.totalorder %s270_s2, %s170_s1  ;;  %p174_p0 = scmp.lt.u32.totalorder %s170_s1, %s270_s2 }
  0x26   :  { %p176_p1 = pnand %p174_p0, %p171_p13 }
  0x28   :  { %179 = shalt.err (!%p176_p1)
}
  0x29   :  { %118 = dma.vmem_to_hbm [thread:$0]  %s113_s24, 256, %s270_s2, [#allocation4], %s185_s19, %s185_s19, %s186_s20  }
  0x2a   :  { %182 = dma.done.wait [#allocation4], 256  }
  0x2b   :  { %183 = vsyncadd [#allocation4], 4294967040 }
  0x2c   :  { %122 = vsyncpa [#allocation3], 1 }
  0x2d   :  { %123 = vsyncpa [#allocation4], 1 }

</bundles_post_ra>
